<compile_context>
chip_gen: v5e
topology: v5e:2x2
jax: 0.10.0
libtpu: 0.0.40
codegen_flags: <defaults>
</compile_context>

<pallas_src>
import functools

import numpy as np

import jax
import jax.numpy as jnp
from jax import lax
from jax.experimental import pallas as pl
from jax.experimental.pallas import tpu as pltpu


# ----------------------------------------------------------------------------
# Kernel
# ----------------------------------------------------------------------------
def _double_conv_kernel(x_ref, w1_ref, b1_ref, w2_ref, b2_ref, o_ref,
                        xpad_ref, mid_ref, *, H, W, Cin, Cmid):
    # x_ref:    (H, W*Cin)                whole image (lane-dense), one batch elem
    # w1_ref:   (3, (W+2)*Cin,  W*Cmid)   banded conv1 weights (BN1 scale folded)
    # b1_ref:   (1, W*Cmid)               BN1 bias, tiled over W
    # w2_ref:   (3, (W+2)*Cmid, W*Cout)   banded conv2 weights (BN2 scale folded)
    # b2_ref:   (1, W*Cout)               BN2 bias, tiled over W
    # o_ref:    (th, W*Cout)              output tile (lane-dense)
    # xpad_ref: (th+4, (W+2)*Cin)         zero-padded + halo'ed input tile (VMEM)
    # mid_ref:  (th+2, (W+2)*Cmid)        zero-padded mid activation (VMEM only)
    th = o_ref.shape[0]

    h = pl.program_id(1)
    nh = pl.num_programs(1)
    row0 = h * th                       # first output row of this tile

    # ---- 1. gather zero-padded, halo'ed input rows into VMEM ---------------
    xpad_ref[...] = jnp.zeros_like(xpad_ref)

    is_first = h == 0
    is_last = h == nh - 1

    def copy_rows(src_start, n_rows, dst_start):
        # valid W columns sit at lane offset Cin .. (W+1)*Cin (pad=1 each side)
        xpad_ref[dst_start:dst_start + n_rows, Cin:(W + 1) * Cin] = (
            x_ref[pl.ds(src_start, n_rows), :])

    @pl.when(jnp.logical_and(is_first, is_last))
    def _():                                  # single tile: whole image
        copy_rows(0, th, 2)

    @pl.when(jnp.logical_and(is_first, jnp.logical_not(is_last)))
    def _():                                  # top tile: halo rows below only
        copy_rows(0, th + 2, 2)

    @pl.when(jnp.logical_and(is_last, jnp.logical_not(is_first)))
    def _():                                  # bottom tile: halo rows above only
        copy_rows(row0 - 2, th + 2, 0)

    @pl.when(jnp.logical_and(jnp.logical_not(is_first),
                             jnp.logical_not(is_last)))
    def _():                                  # interior tile: halo both sides
        copy_rows(row0 - 2, th + 4, 0)

    # ---- 2. conv1 (BN1 scale folded) + bias + ReLU -> mid (VMEM only) ------
    # One matmul per kernel row kh; contiguous row slices, no relayouts.
    acc1 = jnp.zeros((th + 2, W * Cmid), jnp.float32)
    for kh in range(3):
        acc1 = acc1 + jnp.dot(xpad_ref[kh:kh + th + 2, :], w1_ref[kh],
                              preferred_element_type=jnp.float32)
    m = jnp.maximum(acc1 + b1_ref[...], 0.0)

    # Mid rows that fall outside the image are conv2's zero padding, not conv1
    # outputs -> mask them (only bites on the first / last H-tile).
    gmid = (row0 - 1) + lax.broadcasted_iota(jnp.int32, (th + 2, W * Cmid), 0)
    m = jnp.where(jnp.logical_and(gmid >= 0, gmid < H), m, 0.0)

    mid_ref[...] = jnp.zeros_like(mid_ref)          # zero W borders
    mid_ref[:, Cmid:(W + 1) * Cmid] = m

    # ---- 3. conv2 (BN2 scale folded) + bias + ReLU -> output ---------------
    acc2 = jnp.zeros((th, o_ref.shape[1]), jnp.float32)
    for kh in range(3):
        acc2 = acc2 + jnp.dot(mid_ref[kh:kh + th, :], w2_ref[kh],
                              preferred_element_type=jnp.float32)
    y = jnp.maximum(acc2 + b2_ref[...], 0.0)
    o_ref[...] = y.astype(o_ref.dtype)              # lane-dense (th, W*Cout)


# ----------------------------------------------------------------------------
# Wrapper / glue
# ----------------------------------------------------------------------------
def fold_bn(gamma, beta, running_mean, running_var, eps=1e-5):
    scale = gamma / jnp.sqrt(running_var + eps)
    bias = beta - running_mean * scale
    return scale, bias


def _banded_conv_weights(w_hwio, scale, W):
    """Fold BN scale into w and lower the 3x3 conv to 3 banded matmul weights.

    Returns B with shape (3, (W+2)*Cin, W*Cout) such that
      B[kh, wp*Cin + ci, w*Cout + co] = w[kh, wp - w, ci, co] * scale[co]
    when 0 <= wp - w <= 2, else 0.  A row slice of the W-padded input times
    B[kh], summed over kh, is exactly the stride-1 pad-1 conv output row.
    """
    _, _, Cin, Cout = w_hwio.shape
    wf = w_hwio * scale[None, None, None, :]        # fold BN scale (per Cout)
    sel = np.zeros((3, W + 2, W), np.float32)
    for kw in range(3):
        sel[kw, np.arange(W) + kw, np.arange(W)] = 1.0
    band = jnp.einsum("xpw,kxco->kpcwo", jnp.asarray(sel), wf)
    return band.reshape(3, (W + 2) * Cin, W * Cout)


def _pick_tile_h(H):
    # Largest multiple-of-8 H tile that divides H and leaves >= 2 tiles
    # (keeps the VMEM working set bounded and gives the grid parallel work);
    # fall back to the full height for tiny images.
    for th in (64, 32, 16, 8):
        if H % th == 0 and H // th >= 2:
            return th
    return H


def double_conv_pallas(x_nchw, params, *, eps=1e-5, tile_h=None, interpret=False):
    """DoubleConv forward (eval-mode BN). x_nchw: (N, Cin, H, W) -> (N, Cout, H, W)."""
    N, Cin, H, W = x_nchw.shape
    Cmid = params["w1"].shape[-1]
    Cout = params["w2"].shape[-1]

    th = _pick_tile_h(H) if tile_h is None else tile_h
    if H % th != 0 or not (th % 8 == 0 or th == H):
        raise ValueError(f"tile_h={th} must divide H={H} and be a multiple of 8")
    nh = H // th

    # NCHW -> NHWC -> lane-dense (N, H, W*Cin): channels folded into lanes.
    x = jnp.transpose(x_nchw, (0, 2, 3, 1)).reshape(N, H, W * Cin)

    s1, bb1 = fold_bn(params["gamma1"], params["beta1"],
                      params["mean1"], params["var1"], eps)
    s2, bb2 = fold_bn(params["gamma2"], params["beta2"],
                      params["mean2"], params["var2"], eps)

    w1 = _banded_conv_weights(params["w1"], s1, W)   # (3, (W+2)*Cin,  W*Cmid)
    w2 = _banded_conv_weights(params["w2"], s2, W)   # (3, (W+2)*Cmid, W*Cout)
    b1 = jnp.tile(bb1, W).reshape(1, W * Cmid)
    b2 = jnp.tile(bb2, W).reshape(1, W * Cout)

    kernel = functools.partial(_double_conv_kernel,
                               H=H, W=W, Cin=Cin, Cmid=Cmid)

    out = pl.pallas_call(
        kernel,
        out_shape=jax.ShapeDtypeStruct((N, H, W * Cout), jnp.float32),
        grid=(N, nh),
        in_specs=[
            # full image per batch element (fetched once per n; h revisits it)
            pl.BlockSpec((None, H, W * Cin), lambda n, h: (n, 0, 0)),
            pl.BlockSpec((3, (W + 2) * Cin, W * Cmid), lambda n, h: (0, 0, 0)),
            pl.BlockSpec((1, W * Cmid), lambda n, h: (0, 0)),
            pl.BlockSpec((3, (W + 2) * Cmid, W * Cout), lambda n, h: (0, 0, 0)),
            pl.BlockSpec((1, W * Cout), lambda n, h: (0, 0)),
        ],
        out_specs=pl.BlockSpec((None, th, W * Cout), lambda n, h: (n, h, 0)),
        scratch_shapes=[
            pltpu.VMEM((th + 4, (W + 2) * Cin), jnp.float32),   # padded input tile
            pltpu.VMEM((th + 2, (W + 2) * Cmid), jnp.float32),  # mid activation
        ],
        compiler_params=pltpu.CompilerParams(
            dimension_semantics=("parallel", "parallel"),
            vmem_limit_bytes=32 * 1024 * 1024,   # safe on v5e/v6e/v7x
        ),
        interpret=interpret,
    )(x, w1, b1, w2, b2)

    # lane-dense (N, H, W*Cout) -> NHWC -> NCHW
    return jnp.transpose(out.reshape(N, H, W, Cout), (0, 3, 1, 2))


# ----------------------------------------------------------------------------
# Pure-JAX reference and parameter init (for the self-check)
# ----------------------------------------------------------------------------
def double_conv_reference(x_nchw, params, eps=1e-5):
    """Pure-JAX NCHW reference matching the PyTorch eval-mode forward."""
    def conv(x, w_oihw):
        return lax.conv_general_dilated(
            x, w_oihw, window_strides=(1, 1), padding=((1, 1), (1, 1)),
            dimension_numbers=("NCHW", "OIHW", "NCHW"))

    def bn(x, gamma, beta, mean, var):
        g = gamma.reshape(1, -1, 1, 1)
        b = beta.reshape(1, -1, 1, 1)
        m = mean.reshape(1, -1, 1, 1)
        v = var.reshape(1, -1, 1, 1)
        return (x - m) / jnp.sqrt(v + eps) * g + b

    w1_oihw = jnp.transpose(params["w1"], (3, 2, 0, 1))
    w2_oihw = jnp.transpose(params["w2"], (3, 2, 0, 1))

    y = conv(x_nchw, w1_oihw)
    y = jnp.maximum(bn(y, params["gamma1"], params["beta1"],
                       params["mean1"], params["var1"]), 0.0)
    y = conv(y, w2_oihw)
    y = jnp.maximum(bn(y, params["gamma2"], params["beta2"],
                       params["mean2"], params["var2"]), 0.0)
    return y


def init_params(key, in_channel, out_channel, mid_channel=None):
    if not mid_channel:
        mid_channel = out_channel
    k1, k2, k3, k4, k5, k6 = jax.random.split(key, 6)
    return {
        # Conv weights stored HWIO (3, 3, Cin, Cout).
        "w1": 0.1 * jax.random.normal(k1, (3, 3, in_channel, mid_channel),
                                      jnp.float32),
        "w2": 0.1 * jax.random.normal(k2, (3, 3, mid_channel, out_channel),
                                      jnp.float32),
        # BatchNorm params / running stats (deterministic, non-trivial).
        "gamma1": 1.0 + 0.1 * jax.random.normal(k3, (mid_channel,), jnp.float32),
        "beta1": 0.1 * jax.random.normal(k4, (mid_channel,), jnp.float32),
        "mean1": jnp.zeros((mid_channel,), jnp.float32),
        "var1": jnp.ones((mid_channel,), jnp.float32),
        "gamma2": 1.0 + 0.1 * jax.random.normal(k5, (out_channel,), jnp.float32),
        "beta2": 0.1 * jax.random.normal(k6, (out_channel,), jnp.float32),
        "mean2": jnp.zeros((out_channel,), jnp.float32),
        "var2": jnp.ones((out_channel,), jnp.float32),
    }


if __name__ == "__main__":
    key = jax.random.PRNGKey(0)
    kx, kp = jax.random.split(key)

    N, Cin, Cout, H, W = 2, 4, 8, 16, 16
    x = jax.random.normal(kx, (N, Cin, H, W), jnp.float32)
    params = init_params(kp, Cin, Cout)

    out = jax.block_until_ready(double_conv_pallas(x, params))
    ref = jax.block_until_ready(double_conv_reference(x, params))

    assert out.shape == (N, Cout, H, W), out.shape
    err = float(jnp.max(jnp.abs(out - ref)))
    if err > 2e-4:
        raise AssertionError(f"mismatch vs reference: max abs err = {err}")

    print("KERNEL_OK")
</pallas_src>

<mosaic_0001>
module attributes {stable_mosaic.version = 11 : i64} {
  func.func @_double_conv_kernel(%arg0: i32, %arg1: i32, %arg2: memref<1x16x64xf32, #tpu.memory_space<vmem>>, %arg3: memref<3x72x128xf32, #tpu.memory_space<vmem>>, %arg4: memref<1x128xf32, #tpu.memory_space<vmem>>, %arg5: memref<3x144x128xf32, #tpu.memory_space<vmem>>, %arg6: memref<1x128xf32, #tpu.memory_space<vmem>>, %arg7: memref<1x8x128xf32, #tpu.memory_space<vmem>>, %arg8: memref<12x72xf32, #tpu.memory_space<vmem>>, %arg9: memref<10x144xf32, #tpu.memory_space<vmem>>) attributes {dimension_semantics = [#tpu.dimension_semantics<parallel>, #tpu.dimension_semantics<parallel>], iteration_bounds = array<i64: 2, 2>, scalar_prefetch = 0 : i64, scratch_operands = 2 : i64, tpu.core_type = #tpu.core_type<tc>, window_params = [{transform_indices = @transform_0, window_bounds = array<i64: 1, 16, 64>}, {pipeline_mode = #tpu.pipeline_mode<synchronous>, transform_indices = @transform_1, window_bounds = array<i64: 3, 72, 128>}, {pipeline_mode = #tpu.pipeline_mode<synchronous>, transform_indices = @transform_2, window_bounds = array<i64: 1, 128>}, {pipeline_mode = #tpu.pipeline_mode<synchronous>, transform_indices = @transform_3, window_bounds = array<i64: 3, 144, 128>}, {pipeline_mode = #tpu.pipeline_mode<synchronous>, transform_indices = @transform_4, window_bounds = array<i64: 1, 128>}, {transform_indices = @transform_5, window_bounds = array<i64: 1, 8, 128>}]} {
    %c8_i32 = arith.constant 8 : i32
    %0 = arith.muli %arg1, %c8_i32 : i32
    %cst = arith.constant 0.000000e+00 : f32
    %1 = vector.broadcast %cst : f32 to vector<12x72xf32>
    %c0 = arith.constant 0 : index
    %c0_0 = arith.constant 0 : index
    %2 = vector.load %arg8[%c0, %c0_0] : memref<12x72xf32, #tpu.memory_space<vmem>>, vector<12x72xf32>
    tpu.vector_store %arg8[%c0, %c0_0], %1 {strides = array<i32>} : memref<12x72xf32, #tpu.memory_space<vmem>>, vector<12x72xf32>,
    %c0_i32 = arith.constant 0 : i32
    %3 = arith.cmpi eq, %arg1, %c0_i32 : i32
    %c1_i32 = arith.constant 1 : i32
    %4 = arith.cmpi eq, %arg1, %c1_i32 : i32
    %5 = arith.andi %3, %4 : i1
    %6 = arith.extui %5 : i1 to i32
    %c0_i32_1 = arith.constant 0 : i32
    %7 = arith.cmpi ne, %6, %c0_i32_1 : i32
    scf.if %7 {
      %c0_60 = arith.constant 0 : index
      %c0_61 = arith.constant 0 : index
      %c0_62 = arith.constant 0 : index
      %80 = vector.load %arg2[%c0_60, %c0_61, %c0_62] : memref<1x16x64xf32, #tpu.memory_space<vmem>>, vector<1x8x64xf32>
      %81 = vector.shape_cast %80 : vector<1x8x64xf32> to vector<8x64xf32>
      %c2_63 = arith.constant 2 : index
      %c4 = arith.constant 4 : index
      %82 = vector.load %arg8[%c2_63, %c4] : memref<12x72xf32, #tpu.memory_space<vmem>>, vector<8x64xf32>
      tpu.vector_store %arg8[%c2_63, %c4], %81 {strides = array<i32>} : memref<12x72xf32, #tpu.memory_space<vmem>>, vector<8x64xf32>,
    } else {
    }
    %true = arith.constant true
    %8 = arith.xori %4, %true : i1
    %9 = arith.andi %3, %8 : i1
    %10 = arith.extui %9 : i1 to i32
    %c0_i32_2 = arith.constant 0 : i32
    %11 = arith.cmpi ne, %10, %c0_i32_2 : i32
    scf.if %11 {
      %c0_60 = arith.constant 0 : index
      %c0_61 = arith.constant 0 : index
      %c0_62 = arith.constant 0 : index
      %80 = vector.load %arg2[%c0_60, %c0_61, %c0_62] : memref<1x16x64xf32, #tpu.memory_space<vmem>>, vector<1x10x64xf32>
      %81 = vector.shape_cast %80 : vector<1x10x64xf32> to vector<10x64xf32>
      %c2_63 = arith.constant 2 : index
      %c4 = arith.constant 4 : index
      %82 = vector.load %arg8[%c2_63, %c4] : memref<12x72xf32, #tpu.memory_space<vmem>>, vector<10x64xf32>
      tpu.vector_store %arg8[%c2_63, %c4], %81 {strides = array<i32>} : memref<12x72xf32, #tpu.memory_space<vmem>>, vector<10x64xf32>,
    } else {
    }
    %true_3 = arith.constant true
    %12 = arith.xori %3, %true_3 : i1
    %13 = arith.andi %4, %12 : i1
    %14 = arith.extui %13 : i1 to i32
    %c0_i32_4 = arith.constant 0 : i32
    %15 = arith.cmpi ne, %14, %c0_i32_4 : i32
    scf.if %15 {
      %c2_i32 = arith.constant 2 : i32
      %80 = arith.subi %0, %c2_i32 : i32
      %c0_60 = arith.constant 0 : index
      %81 = arith.index_cast %80 : i32 to index
      %c0_61 = arith.constant 0 : index
      %82 = vector.load %arg2[%c0_60, %81, %c0_61] : memref<1x16x64xf32, #tpu.memory_space<vmem>>, vector<1x10x64xf32>
      %83 = vector.shape_cast %82 : vector<1x10x64xf32> to vector<10x64xf32>
      %c0_62 = arith.constant 0 : index
      %c4 = arith.constant 4 : index
      %84 = vector.load %arg8[%c0_62, %c4] : memref<12x72xf32, #tpu.memory_space<vmem>>, vector<10x64xf32>
      tpu.vector_store %arg8[%c0_62, %c4], %83 {strides = array<i32>} : memref<12x72xf32, #tpu.memory_space<vmem>>, vector<10x64xf32>,
    } else {
    }
    %true_5 = arith.constant true
    %16 = arith.xori %3, %true_5 : i1
    %true_6 = arith.constant true
    %17 = arith.xori %4, %true_6 : i1
    %18 = arith.andi %16, %17 : i1
    %19 = arith.extui %18 : i1 to i32
    %c0_i32_7 = arith.constant 0 : i32
    %20 = arith.cmpi ne, %19, %c0_i32_7 : i32
    scf.if %20 {
      %c2_i32 = arith.constant 2 : i32
      %80 = arith.subi %0, %c2_i32 : i32
      %c0_60 = arith.constant 0 : index
      %81 = arith.index_cast %80 : i32 to index
      %c0_61 = arith.constant 0 : index
      %82 = vector.load %arg2[%c0_60, %81, %c0_61] : memref<1x16x64xf32, #tpu.memory_space<vmem>>, vector<1x12x64xf32>
      %83 = vector.shape_cast %82 : vector<1x12x64xf32> to vector<12x64xf32>
      %c0_62 = arith.constant 0 : index
      %c4 = arith.constant 4 : index
      %84 = vector.load %arg8[%c0_62, %c4] : memref<12x72xf32, #tpu.memory_space<vmem>>, vector<12x64xf32>
      tpu.vector_store %arg8[%c0_62, %c4], %83 {strides = array<i32>} : memref<12x72xf32, #tpu.memory_space<vmem>>, vector<12x64xf32>,
    } else {
    }
    %cst_8 = arith.constant 0.000000e+00 : f32
    %21 = vector.broadcast %cst_8 : f32 to vector<10x128xf32>
    %c0_9 = arith.constant 0 : index
    %c0_10 = arith.constant 0 : index
    %22 = vector.load %arg8[%c0_9, %c0_10] : memref<12x72xf32, #tpu.memory_space<vmem>>, vector<10x72xf32>
    %c0_11 = arith.constant 0 : index
    %c0_12 = arith.constant 0 : index
    %c0_13 = arith.constant 0 : index
    %23 = vector.load %arg3[%c0_11, %c0_12, %c0_13] : memref<3x72x128xf32, #tpu.memory_space<vmem>>, vector<1x72x128xf32>
    %24 = vector.shape_cast %23 : vector<1x72x128xf32> to vector<72x128xf32>
    %cst_14 = arith.constant dense<0.000000e+00> : vector<10x128xf32>
    %25 = tpu.matmul %22, %24, %cst_14 {dimension_numbers = #tpu.dot_dimension_numbers<[1], [0], [0], [1], [0, 0, 1, 1], [], []>} : vector<10x72xf32>, vector<72x128xf32>, vector<10x128xf32> -> vector<10x128xf32>
    %26 = arith.addf %21, %25 : vector<10x128xf32>
    %c1 = arith.constant 1 : index
    %c0_15 = arith.constant 0 : index
    %27 = vector.load %arg8[%c1, %c0_15] : memref<12x72xf32, #tpu.memory_space<vmem>>, vector<10x72xf32>
    %c1_16 = arith.constant 1 : index
    %c0_17 = arith.constant 0 : index
    %c0_18 = arith.constant 0 : index
    %28 = vector.load %arg3[%c1_16, %c0_17, %c0_18] : memref<3x72x128xf32, #tpu.memory_space<vmem>>, vector<1x72x128xf32>
    %29 = vector.shape_cast %28 : vector<1x72x128xf32> to vector<72x128xf32>
    %cst_19 = arith.constant dense<0.000000e+00> : vector<10x128xf32>
    %30 = tpu.matmul %27, %29, %cst_19 {dimension_numbers = #tpu.dot_dimension_numbers<[1], [0], [0], [1], [0, 0, 1, 1], [], []>} : vector<10x72xf32>, vector<72x128xf32>, vector<10x128xf32> -> vector<10x128xf32>
    %31 = arith.addf %26, %30 : vector<10x128xf32>
    %c2 = arith.constant 2 : index
    %c0_20 = arith.constant 0 : index
    %32 = vector.load %arg8[%c2, %c0_20] : memref<12x72xf32, #tpu.memory_space<vmem>>, vector<10x72xf32>
    %c2_21 = arith.constant 2 : index
    %c0_22 = arith.constant 0 : index
    %c0_23 = arith.constant 0 : index
    %33 = vector.load %arg3[%c2_21, %c0_22, %c0_23] : memref<3x72x128xf32, #tpu.memory_space<vmem>>, vector<1x72x128xf32>
    %34 = vector.shape_cast %33 : vector<1x72x128xf32> to vector<72x128xf32>
    %cst_24 = arith.constant dense<0.000000e+00> : vector<10x128xf32>
    %35 = tpu.matmul %32, %34, %cst_24 {dimension_numbers = #tpu.dot_dimension_numbers<[1], [0], [0], [1], [0, 0, 1, 1], [], []>} : vector<10x72xf32>, vector<72x128xf32>, vector<10x128xf32> -> vector<10x128xf32>
    %36 = arith.addf %31, %35 : vector<10x128xf32>
    %c0_25 = arith.constant 0 : index
    %c0_26 = arith.constant 0 : index
    %37 = vector.load %arg4[%c0_25, %c0_26] : memref<1x128xf32, #tpu.memory_space<vmem>>, vector<1x128xf32>
    %38 = vector.broadcast %37 : vector<1x128xf32> to vector<10x128xf32>
    %39 = arith.addf %36, %38 : vector<10x128xf32>
    %cst_27 = arith.constant 0.000000e+00 : f32
    %40 = vector.broadcast %cst_27 : f32 to vector<10x128xf32>
    %41 = arith.maximumf %39, %40 : vector<10x128xf32>
    %c1_i32_28 = arith.constant 1 : i32
    %42 = arith.subi %0, %c1_i32_28 : i32
    %43 = tpu.iota {dimensions = array<i32: 0>} : vector<10x128xi32>
    %44 = vector.broadcast %42 : i32 to vector<10x128xi32>
    %45 = arith.addi %44, %43 : vector<10x128xi32>
    %c0_i32_29 = arith.constant 0 : i32
    %46 = vector.broadcast %c0_i32_29 : i32 to vector<10x128xi32>
    %47 = arith.cmpi sge, %45, %46 : vector<10x128xi32>
    %c16_i32 = arith.constant 16 : i32
    %48 = vector.broadcast %c16_i32 : i32 to vector<10x128xi32>
    %49 = arith.cmpi slt, %45, %48 : vector<10x128xi32>
    %50 = arith.andi %47, %49 : vector<10x128xi1>
    %cst_30 = arith.constant 0.000000e+00 : f32
    %51 = vector.broadcast %cst_30 : f32 to vector<10x128xf32>
    %52 = arith.select %50, %41, %51 : vector<10x128xi1>, vector<10x128xf32>
    %cst_31 = arith.constant 0.000000e+00 : f32
    %53 = vector.broadcast %cst_31 : f32 to vector<10x144xf32>
    %c0_32 = arith.constant 0 : index
    %c0_33 = arith.constant 0 : index
    %54 = vector.load %arg9[%c0_32, %c0_33] : memref<10x144xf32, #tpu.memory_space<vmem>>, vector<10x144xf32>
    tpu.vector_store %arg9[%c0_32, %c0_33], %53 {strides = array<i32>} : memref<10x144xf32, #tpu.memory_space<vmem>>, vector<10x144xf32>,
    %c0_34 = arith.constant 0 : index
    %c8 = arith.constant 8 : index
    %55 = vector.load %arg9[%c0_34, %c8] : memref<10x144xf32, #tpu.memory_space<vmem>>, vector<10x128xf32>
    tpu.vector_store %arg9[%c0_34, %c8], %52 {strides = array<i32>} : memref<10x144xf32, #tpu.memory_space<vmem>>, vector<10x128xf32>,
    %cst_35 = arith.constant 0.000000e+00 : f32
    %56 = vector.broadcast %cst_35 : f32 to vector<8x128xf32>
    %c0_36 = arith.constant 0 : index
    %c0_37 = arith.constant 0 : index
    %57 = vector.load %arg9[%c0_36, %c0_37] : memref<10x144xf32, #tpu.memory_space<vmem>>, vector<8x144xf32>
    %c0_38 = arith.constant 0 : index
    %c0_39 = arith.constant 0 : index
    %c0_40 = arith.constant 0 : index
    %58 = vector.load %arg5[%c0_38, %c0_39, %c0_40] : memref<3x144x128xf32, #tpu.memory_space<vmem>>, vector<1x144x128xf32>
    %59 = vector.shape_cast %58 : vector<1x144x128xf32> to vector<144x128xf32>
    %cst_41 = arith.constant dense<0.000000e+00> : vector<8x128xf32>
    %60 = tpu.matmul %57, %59, %cst_41 {dimension_numbers = #tpu.dot_dimension_numbers<[1], [0], [0], [1], [0, 0, 1, 1], [], []>} : vector<8x144xf32>, vector<144x128xf32>, vector<8x128xf32> -> vector<8x128xf32>
    %61 = arith.addf %56, %60 : vector<8x128xf32>
    %c1_42 = arith.constant 1 : index
    %c0_43 = arith.constant 0 : index
    %62 = vector.load %arg9[%c1_42, %c0_43] : memref<10x144xf32, #tpu.memory_space<vmem>>, vector<8x144xf32>
    %c1_44 = arith.constant 1 : index
    %c0_45 = arith.constant 0 : index
    %c0_46 = arith.constant 0 : index
    %63 = vector.load %arg5[%c1_44, %c0_45, %c0_46] : memref<3x144x128xf32, #tpu.memory_space<vmem>>, vector<1x144x128xf32>
    %64 = vector.shape_cast %63 : vector<1x144x128xf32> to vector<144x128xf32>
    %cst_47 = arith.constant dense<0.000000e+00> : vector<8x128xf32>
    %65 = tpu.matmul %62, %64, %cst_47 {dimension_numbers = #tpu.dot_dimension_numbers<[1], [0], [0], [1], [0, 0, 1, 1], [], []>} : vector<8x144xf32>, vector<144x128xf32>, vector<8x128xf32> -> vector<8x128xf32>
    %66 = arith.addf %61, %65 : vector<8x128xf32>
    %c2_48 = arith.constant 2 : index
    %c0_49 = arith.constant 0 : index
    %67 = vector.load %arg9[%c2_48, %c0_49] : memref<10x144xf32, #tpu.memory_space<vmem>>, vector<8x144xf32>
    %c2_50 = arith.constant 2 : index
    %c0_51 = arith.constant 0 : index
    %c0_52 = arith.constant 0 : index
    %68 = vector.load %arg5[%c2_50, %c0_51, %c0_52] : memref<3x144x128xf32, #tpu.memory_space<vmem>>, vector<1x144x128xf32>
    %69 = vector.shape_cast %68 : vector<1x144x128xf32> to vector<144x128xf32>
    %cst_53 = arith.constant dense<0.000000e+00> : vector<8x128xf32>
    %70 = tpu.matmul %67, %69, %cst_53 {dimension_numbers = #tpu.dot_dimension_numbers<[1], [0], [0], [1], [0, 0, 1, 1], [], []>} : vector<8x144xf32>, vector<144x128xf32>, vector<8x128xf32> -> vector<8x128xf32>
    %71 = arith.addf %66, %70 : vector<8x128xf32>
    %c0_54 = arith.constant 0 : index
    %c0_55 = arith.constant 0 : index
    %72 = vector.load %arg6[%c0_54, %c0_55] : memref<1x128xf32, #tpu.memory_space<vmem>>, vector<1x128xf32>
    %73 = vector.broadcast %72 : vector<1x128xf32> to vector<8x128xf32>
    %74 = arith.addf %71, %73 : vector<8x128xf32>
    %cst_56 = arith.constant 0.000000e+00 : f32
    %75 = vector.broadcast %cst_56 : f32 to vector<8x128xf32>
    %76 = arith.maximumf %74, %75 : vector<8x128xf32>
    %c0_57 = arith.constant 0 : index
    %c0_58 = arith.constant 0 : index
    %c0_59 = arith.constant 0 : index
    %77 = vector.load %arg7[%c0_57, %c0_58, %c0_59] : memref<1x8x128xf32, #tpu.memory_space<vmem>>, vector<1x8x128xf32>
    %78 = vector.shape_cast %77 : vector<1x8x128xf32> to vector<8x128xf32>
    %79 = vector.shape_cast %76 : vector<8x128xf32> to vector<1x8x128xf32>
    tpu.vector_store %arg7[%c0_57, %c0_58, %c0_59], %79 {strides = array<i32>} : memref<1x8x128xf32, #tpu.memory_space<vmem>>, vector<1x8x128xf32>,
    return
  }
  func.func @transform_0(%arg0: i32, %arg1: i32) -> (i32, i32, i32) {
    %c0_i32 = arith.constant 0 : i32
    %c0_i32_0 = arith.constant 0 : i32
    %c0_i32_1 = arith.constant 0 : i32
    return %arg0, %c0_i32, %c0_i32_0 : i32, i32, i32
  }
  func.func @transform_1(%arg0: i32, %arg1: i32) -> (i32, i32, i32) {
    %c0_i32 = arith.constant 0 : i32
    %c0_i32_0 = arith.constant 0 : i32
    %c0_i32_1 = arith.constant 0 : i32
    %c0_i32_2 = arith.constant 0 : i32
    return %c0_i32, %c0_i32_0, %c0_i32_1 : i32, i32, i32
  }
  func.func @transform_2(%arg0: i32, %arg1: i32) -> (i32, i32) {
    %c0_i32 = arith.constant 0 : i32
    %c0_i32_0 = arith.constant 0 : i32
    %c0_i32_1 = arith.constant 0 : i32
    return %c0_i32, %c0_i32_0 : i32, i32
  }
  func.func @transform_3(%arg0: i32, %arg1: i32) -> (i32, i32, i32) {
    %c0_i32 = arith.constant 0 : i32
    %c0_i32_0 = arith.constant 0 : i32
    %c0_i32_1 = arith.constant 0 : i32
    %c0_i32_2 = arith.constant 0 : i32
    return %c0_i32, %c0_i32_0, %c0_i32_1 : i32, i32, i32
  }
  func.func @transform_4(%arg0: i32, %arg1: i32) -> (i32, i32) {
    %c0_i32 = arith.constant 0 : i32
    %c0_i32_0 = arith.constant 0 : i32
    %c0_i32_1 = arith.constant 0 : i32
    return %c0_i32, %c0_i32_0 : i32, i32
  }
  func.func @transform_5(%arg0: i32, %arg1: i32) -> (i32, i32, i32) {
    %c0_i32 = arith.constant 0 : i32
    %c0_i32_0 = arith.constant 0 : i32
    return %arg0, %arg1, %c0_i32 : i32, i32, i32
  }
}

</mosaic_0001>

<bundles_post_ra>
// kernel: tpu_custom_call.1
= control target key start
LH: loop header
LB: loop body
LE: loop exit
PB: predicated region body
PF: predicated region fallthrough
CT: control target
= control target key end

     0   :  { %s1582_s0 = inlined_call_operand.hbm [shape: f32[2,16,64], index: 0, kind: input, shape index: {}]   ;;  %s1583_s1 = inlined_call_operand.hbm [shape: f32[3,72,128], index: 1, kind: input, shape index: {}]   ;;  %s1584_s2 = inlined_call_operand.vmem [shape: f32[1,128], index: 2, kind: input, shape index: {}]   ;;  %s1585_s3 = inlined_call_operand.hbm [shape: f32[3,144,128], index: 3, kind: input, shape index: {}]   ;;  %s1586_s4 = inlined_call_operand.vmem [shape: f32[1,128], index: 4, kind: input, shape index: {}]   ;;  %s1587_s5 = inlined_call_operand.hbm [shape: f32[2,16,128], index: 5, kind: output, shape index: {}]  }
   0x1   :  { %1598 = sst [smem:[#allocation20_spill]] %s1583_s1 }
   0x2   :  { %1599 = sst [smem:[#allocation21_spill]] %s1585_s3 }
   0x3   :  { %1600 = sst [smem:[#allocation22_spill]] %s1586_s4 }
   0x4   :  { %1601 = sst [smem:[#allocation23_spill]] %s1587_s5 }
   0x5   :  { %10 = vsyncpa [#allocation5], 0 }
   0x6   :  { %12 = vsyncpa [#allocation5 + $0x1], 0 }
   0x7   :  { %13 = vsyncpa [#allocation8], 0 }
   0x8   :  { %14 = vsyncpa [#allocation6], 0 }
   0x9   :  { %16 = vsyncpa [#allocation6 + $0x1], 0  ;;  %s1310_s18 = smov 0   ;;  %s1312_s19 = smov 0  }
   0xa   :  { %s1314_s20 = smov 0   ;;  %s1316_s21 = smov 0  }
   0xb   :  { %s1318_s22 = smov 0   ;;  %s1320_s23 = smov 0  }
   0xc   :  { %s1322_s24 = smov 0   ;;  %s1324_s25 = smov 0  }
   0xd   :  { %s1326_s26 = smov 0   ;;  %s1328_s27 = smov 0  }
   0xe   :  { %s1330_s28 = smov 0  }
   0xf LB: > { %1602 = sst [smem:[#allocation14_spill]] %s1228_s18  ;;  %s886_s29 = sadd.s32 4294967295, %s1268_s28   ;;  %s1268_s28 = sphi %s1330_s28, %s22_s28   ;;  %s1264_s27 = sphi %s1328_s27, %s1634_s27   ;;  %s1260_s26 = sphi %s1326_s26, %s1625_s26   ;;  %s1256_s25 = sphi %s1324_s25, %s1633_s25   ;;  %s1252_s24 = sphi %s1322_s24, %s1624_s24   ;;  %s1248_s23 = sphi %s1320_s23, %s1632_s23   ;;  %s1244_s22 = sphi %s1318_s22, %s1631_s22   ;;  %s1240_s21 = sphi %s1316_s21, %s1630_s21   ;;  %s1236_s20 = sphi %s1314_s20, %s1629_s20   ;;  %s1232_s19 = sphi %s1312_s19, %s1628_s19   ;;  %s1228_s18 = sphi %s1310_s18, %s1627_s18  }
  0x10   : > { %1603 = sst [smem:[#allocation15_spill]] %s1260_s26  ;;  %s887_s30 = sadd.s32 4294967294, %s1268_s28  }
  0x11   : > { %p54_p0 = scmp.ne.s32.totalorder %s1244_s22, %s1240_s21  ;;  %p1366_p1 = scmp.eq.s32.totalorder %s886_s29, 0 }
  0x12   : > { %p163_p2 = scmp.ne.s32.totalorder %s1236_s20, %s1232_s19  ;;  %p164_p3 = scmp.eq.s32.totalorder %s886_s29, 3 }
  0x13   : > { %p1374_p4 = por %p1366_p1, %p54_p0  ;;  %p169_p5 = scmp.ne.s32.totalorder %s1232_s19, %s1228_s18 }
  0x14   : > { %p1380_p6 = por %p164_p3, %p163_p2  ;;  %p170_p7 = scmp.eq.s32.totalorder %s887_s30, 3 }
  0x15   : > { %p888_p8 = scmp.ge.s32.totalorder %s1268_s28, 1  ;;  %p177_p9 = scmp.lt.s32.totalorder %s1268_s28, 5 }
  0x16   : > { %s1606_s8 = scalar_select %p1380_p6, 1, 0 }
  0x17   : > { %p1386_p10 = por %p170_p7, %p169_p5  ;;  %p1390_p11 = pnand %p888_p8, %p177_p9 }
  0x18   : > { %1607 = sst [smem:[#allocation16_spill]] %s1606_s8  ;;  %s1270_s14 = smov [#allocation7]  }
  0x19   : > { %s1608_s9 = scalar_select %p1386_p10, 1, 0 }
  0x1a   : > { %s1611_s1 = sld [smem:[#allocation20_spill]]  ;;  %p931_p12 = pneg %p1390_p11 }
  0x1b   : > { %1609 = sst [smem:[#allocation17_spill]] %s1608_s9  ;;  %s190_s15 = sshll.u32 %s1270_s14, 4  ;;  %s191_s15 = int_to_ptr.vmem [resolvable:$true] %s190_s15 }
  0x1c   : > { %p932_p13 = pnand %p931_p12, %p1366_p1  ;;  %s1612_s3 = sld [smem:[#allocation21_spill]] }
  0x1d   : > { %s1588_s29 = smov 128   ;;  %s1589_s30 = smov 8  }
  0x1e   : > { %s1273_s11 = smov [#allocation9]   ;;  %s31_s14 = sadd.s32 1, %s1260_s26 }
  0x1f   : > { %s207_s12 = sshll.u32 %s1273_s11, 4  ;;  %p32_p0 = scmp.ge.s32.totalorder %s31_s14, 2  ;;  %s208_s12 = int_to_ptr.vmem [resolvable:$true] %s207_s12 }
  0x20   : > { %s188_s13 = sshll.u32 %s1611_s1, 4  ;;  %s34_s16 = sadd.s32 1, %s1264_s27  ;;  %s189_s13 = int_to_ptr.hbm [resolvable:$true] %s188_s13 }
  0x21   : > { %934 = dma.hbm_to_vmem [thread:$0]  (!%p932_p13), %s189_s13, 3456, %s191_s15, [#allocation8], %s1588_s29, %s1588_s29, %s1589_s30  }
  0x22   : > { %s205_s21 = sshll.u32 %s1612_s3, 4  ;;  %p48_p2 = scmp.ne.s32.totalorder %s1248_s23, %s1244_s22  ;;  %s206_s21 = int_to_ptr.hbm [resolvable:$true] %s205_s21 }
  0x23   : > { %937 = dma.hbm_to_vmem [thread:$0]  (!%p932_p13), %s206_s21, 6912, %s208_s12, [#allocation8], %s1588_s29, %s1588_s29, %s1589_s30  }
  0x24   : > { %s1636_s14 = smov (%p32_p0, %s31_s14), 0  ;;  %s1638_s16 = smov (!%p32_p0, %s34_s16), %s1264_s27 }
  0x25   : > { %1613 = sst [smem:[#allocation18_spill]] %s1636_s14  ;;  %s41_s13 = sadd.s32 1, %s1248_s23 }
  0x26   : > { %p49_p3 = scmp.eq.s32.totalorder %s1268_s28, 0  ;;  %p36_p5 = scmp.ge.s32.totalorder %s1638_s16, 2 }
  0x27   : > { %s149_s15 = ssub.s32 %s1260_s26, %s1636_s14  ;;  %s153_s21 = sadd.s32 1, %s1236_s20 }
  0x28   : > { %p1421_p7 = por %p49_p3, %p48_p2  ;;  %s1640_s16 = smov (%p36_p5, %s1638_s16), 0 }
  0x29   : > { %1615 = sst [smem:[#allocation19_spill]] %s1640_s16  ;;  %p948_p8 = scmp.lt.s32.totalorder %s1268_s28, 4 }
  0x2a   : > { %s224_s11 = sand.u32 1, %s1248_s23   ;;  %s38_s12 = ssub.s32 %s1264_s27, %s1640_s16 }
  0x2b   : > { %s918_s29 = sshll.u32 %s1264_s27, 4  ;;  %p39_p9 = scmp.eq.s32.totalorder %s38_s12, 0 }
  0x2c   : > { %s150_s30 = sor.u32 %s149_s15, %s38_s12  ;;  %s892_s1 = sshll.u32 %s224_s11, 4 }
  0x2d   : > { %p151_p12 = scmp.eq.s32.totalorder %s150_s30, 0  ;;  %s233_s18 = scalar_lea.hbm %s1582_s0, %s918_s29 }
  0x2e   : > { %s1434_s3 = scalar_select %p39_p9, %s1248_s23, %s41_s13  }
  0x2f   : > { %s1437_s14 = scalar_select %p151_p12, %s1236_s20, %s153_s21  }
  0x30   : > { %s234_s5 = sshll.u32 %s233_s18, 4  ;;  %s228_s8 = scalar_lea.vmem [#allocation4], %s892_s1  ;;  %s235_s5 = int_to_ptr.hbm [resolvable:$true] %s234_s5 }
  0x31   : > { %s236_s4 = sshll.u32 %s228_s8, 4  ;;  %p939_p13 = pnand %p948_p8, %p1421_p7  ;;  %s237_s4 = int_to_ptr.vmem [resolvable:$true] %s236_s4 }
  0x32   : > { %s225_s16 = scalar_lea.sflag [#allocation5], %s224_s11  ;;  %s1616_s15 = smov 8  }
  0x33   : > { %s1617_s30 = smov 128   ;;  %248 = sbr.rel (%p1390_p11) target bundleno = 1029 (0x405), region = 40 }
  0x34   : > { %941 = dma.hbm_to_vmem [thread:$0]  (!%p939_p13), %s235_s5, 256, %s237_s4, %s225_s16, %s1617_s30, %s1617_s30, %s1616_s15  }
  0x35   : > { %s250_s26 = sand.u32 (!%p1390_p11), 1, %s1244_s22  }
  0x36   : > { %s896_s9 = sshll.u32 (!%p1390_p11), %s250_s26, 4  ;;  %s251_s18 = scalar_lea.sflag (!%p1390_p11), [#allocation5], %s250_s26 }
  0x37   : > { %s1452_s1 = scalar_lea.vmem (!%p1390_p11), [#allocation4], %s896_s9 }
  0x38   : > { %1215 = dma.done.wait (%p1374_p4), %s251_s18, 256  }
  0x39   : > { %1217 = vsyncadd (%p1374_p4), %s251_s18, 4294967040 }
  0x3a   : > { %1219 = dma.done.wait (%p1366_p1), [#allocation8], 10368  }
  0x3b   : > { %1221 = vsyncadd (%p1366_p1), [#allocation8], 4294956928  ;;  %s289_s4 = sand.u32 1, %s1232_s19   ;;  %s1464_s5 = sshll.u32 %s1252_s24, 3  ;;  %vm293_vm0 = vcmask 588800   ;;  %v1274_v0 = vmov 0.0  }
  0x3c   : > { %s1468_s7 = sshll.u32 %s289_s4, 3  ;;  %294 = vst.msk [vmem:[#allocation2] sm:$0xff] %vm293_vm0, %v1274_v0  ;;  %vm295_vm1 = vcmask 584704   ;;  %p297_p1 = scmp.eq.s32.totalorder %s1252_s24, 0 }
  0x3d   : > { %296 = vst.msk [vmem:[#allocation2 + $0x8] sm:$0xf] %vm295_vm1, %v1274_v0  ;;  %p298_p4 = scmp.eq.s32.totalorder %s1252_s24, 1  ;;  %s291_s6 = scalar_lea.vmem [#allocation10], %s1468_s7 }
  0x3f   : > { %p299_p11 = pnand %p298_p4, %p297_p1 }
  0x40   : > { %s1275_s8 = smov (!%p299_p11), 4  }
  0x41   : > { %302 = sbr.rel (%p299_p11) target bundleno = 187 (0xbb), region = 56 }
  0x46   : > { %v303_v1 = vld [vmem:[%s1452_s1] sm:$0xff]  ;;  %vm308_vm2 = vcmask 556064  }
  0x47   : > { %305 = vrot.lane.b32.xlu0 %v303_v1, %s1275_s8 }
  0xb9   : > { %v306_v2 = vpop.permute.xlu0 %305 }
  0xba   : > { %309 = vst.msk [vmem:[#allocation2 + $0x2] sm:$0xff] %vm308_vm2, %v306_v2 }
  0xbb PF: > { %p310_p0 = scmp.ne.s32.totalorder %s1252_s24, 1 }
  0xbd   : > { %p311_p2 = pnand %p310_p0, %p297_p1 }
  0xbe   : > { %s1276_s10 = smov (!%p311_p2), 4  }
  0xbf   : > { %314 = sbr.rel (%p311_p2) target bundleno = 321 (0x141), region = 60 }
  0xc4   : > { %v315_v3 = vld [vmem:[%s1452_s1] sm:$0xff]  ;;  %v316_v4 = vld [vmem:[%s1452_s1 + $0x8] sm:$0x3]  ;;  %vm325_vm3 = vcmask 556064   ;;  %vm327_vm4 = vcmask 549920  }
  0xc5   : > { %319 = vrot.lane.b32.xlu0 %v315_v3, %s1276_s10 }
  0xcd   : > { %321 = vrot.lane.b32.xlu0 %v316_v4, %s1276_s10 }
 0x137   : > { %v320_v5 = vpop.permute.xlu0 %319 }
 0x138   : > { %326 = vst.msk [vmem:[#allocation2 + $0x2] sm:$0xff] %vm325_vm3, %v320_v5 }
 0x13f   : > { %v322_v6 = vpop.permute.xlu0 %321 }
 0x140   : > { %328 = vst.msk [vmem:[#allocation2 + $0xa] sm:$0x3] %vm327_vm4, %v322_v6 }
 0x141 PF: > { %p329_p3 = scmp.ne.s32.totalorder %s1252_s24, 0 }
 0x143   : > { %p330_p5 = pnand %p329_p3, %p298_p4 }
 0x144   : > { %s901_s29 = sadd.s32 (!%p330_p5), 4294967294, %s1464_s5  ;;  %s1277_s13 = smov (!%p330_p5), 4  }
 0x145   : > { %333 = sbr.rel (%p330_p5) target bundleno = 455 (0x1c7), region = 64  ;;  %s335_s16 = scalar_lea.vmem (!%p330_p5), %s1452_s1, %s901_s29 [#allocation4] }
 0x14a   : > { %v336_v7 = vld [vmem:[%s335_s16] sm:$0xff]  ;;  %v337_v8 = vld [vmem:[%s335_s16 + $0x8] sm:$0x3]  ;;  %vm346_vm5 = vcmask 556064   ;;  %vm348_vm6 = vcmask 549920  }
 0x14b   : > { %340 = vrot.lane.b32.xlu0 %v336_v7, %s1277_s13 }
 0x153   : > { %342 = vrot.lane.b32.xlu0 %v337_v8, %s1277_s13 }
 0x1bd   : > { %v341_v9 = vpop.permute.xlu0 %340 }
 0x1be   : > { %347 = vst.msk [vmem:[#allocation2] sm:$0xff] %vm346_vm5, %v341_v9 }
 0x1c5   : > { %v343_v10 = vpop.permute.xlu0 %342 }
 0x1c6   : > { %349 = vst.msk [vmem:[#allocation2 + $0x8] sm:$0x3] %vm348_vm6, %v343_v10 }
 0x1c7 PF: > { %p350_p7 = pnand %p329_p3, %p310_p0 }
 0x1c8   : > { %s902_s17 = sadd.s32 (!%p350_p7), 4294967294, %s1464_s5  ;;  %s1278_s11 = smov (!%p350_p7), 4  }
 0x1c9   : > { %353 = sbr.rel (%p350_p7) target bundleno = 587 (0x24b), region = 68  ;;  %s355_s21 = scalar_lea.vmem (!%p350_p7), %s1452_s1, %s902_s17 [#allocation4] }
 0x1ce   : > { %v356_v11 = vld [vmem:[%s355_s21] sm:$0xff]  ;;  %v357_v12 = vld [vmem:[%s355_s21 + $0x8] sm:$0xf]  ;;  %vm366_vm7 = vcmask 556064   ;;  %vm368_vm8 = vcmask 551968  }
 0x1cf   : > { %360 = vrot.lane.b32.xlu0 %v356_v11, %s1278_s11 }
 0x1d7   : > { %362 = vrot.lane.b32.xlu0 %v357_v12, %s1278_s11 }
 0x241   : > { %v361_v13 = vpop.permute.xlu0 %360 }
 0x242   : > { %367 = vst.msk [vmem:[#allocation2] sm:$0xff] %vm366_vm7, %v361_v13 }
 0x249   : > { %v363_v14 = vpop.permute.xlu0 %362 }
 0x24a   : > { %369 = vst.msk [vmem:[#allocation2 + $0x8] sm:$0xf] %vm368_vm8, %v363_v14 }
 0x24b PF: > { %v462_v15 = vld [vmem:[#allocation7 + $0xd0] sm:$0xff]  ;;  %v461_v16 = vld [vmem:[#allocation7 + $0xc8] sm:$0xff]  ;;  %517 = vst [vmem:[#allocation3] sm:$0xff] %v1274_v0  ;;  %v380_v18 = vld [vmem:[#allocation7 + $0x40] sm:$0xff]  ;;  %vm518_vm9 = vcmask 130048   ;;  %v503_v57 = vlaneseq  ;;  %s909_s12 = sadd.s32 4294967295, %s1464_s5 }
 0x24c   : > { %v392_v17 = vld [vmem:[#allocation7 + $0x88] sm:$0xff]  ;;  %476 = vmatpush.msra.mxu3 %v462_v15  ;;  %v391_v19 = vld [vmem:[#allocation7 + $0x80] sm:$0xff]  ;;  %520 = vst [vmem:[#allocation3 + $0x10] sm:$0x3] %v1274_v0  ;;  %435 = vmatpush.msra.mxu1 %v380_v18  ;;  %v379_v21 = vld [vmem:[#allocation7 + $0x38] sm:$0xff]  ;;  %v506_v3 = vstv %s909_s12  ;;  %s1279_s26 = smov 8  }
 0x24d   : > { %406 = vmatpush.msra.mxu0 %v392_v17  ;;  %v460_v20 = vld [vmem:[#allocation7 + $0xc0] sm:$0xff]  ;;  %v390_v22 = vld [vmem:[#allocation7 + $0x78] sm:$0xff]  ;;  %v378_v23 = vld [vmem:[#allocation7 + $0x30] sm:$0xff]  ;;  %519 = vst.msk [vmem:[#allocation3 + $0x8] sm:$0xff] %vm518_vm9, %v1274_v0  ;;  %v504_v1 = vshrl.u32 %v503_v57, 7  ;;  %vm531_vm1 = vcmask 1047616  }
 0x24e   : > { %477 = vmatpush.msra.mxu3 %v461_v16  ;;  %436 = vmatpush.msra.mxu1 %v379_v21  ;;  %v459_v24 = vld [vmem:[#allocation7 + $0xb8] sm:$0xff]  ;;  %v389_v25 = vld [vmem:[#allocation7 + $0x70] sm:$0xff]  ;;  %v377_v26 = vld [vmem:[#allocation7 + $0x28] sm:$0xff]  ;;  %vm533_vm2 = vcmask 64512   ;;  %vm535_vm3 = vcmask 1041472   ;;  %vm537_vm4 = vcmask 58368  }
 0x24f   : > { %407 = vmatpush.msra.mxu0 %v391_v19  ;;  %v458_v27 = vld [vmem:[#allocation7 + $0xb0] sm:$0xff]  ;;  %v388_v28 = vld [vmem:[#allocation7 + $0x68] sm:$0xff]  ;;  %v376_v29 = vld [vmem:[#allocation7 + $0x20] sm:$0xff]  ;;  %v507_v11 = vadd.s32 %v506_v3, %v504_v1  ;;  %v505_v17 = vadd.s32 8, %v504_v1  ;;  %vm586_vm5 = vcmask 1046528   ;;  %vm706_vm6 = vcmask 1045504  }
 0x250   : > { %478 = vmatpush.msra.mxu3 %v460_v20  ;;  %437 = vmatpush.msra.mxu1 %v378_v23  ;;  %v457_v30 = vld [vmem:[#allocation7 + $0xa8] sm:$0xff]  ;;  %v387_v31 = vld [vmem:[#allocation7 + $0x60] sm:$0xff]  ;;  %v375_v32 = vld [vmem:[#allocation7 + $0x18] sm:$0xff]  ;;  %s914_s9 = sshll.u32 %s1256_s25, 1  ;;  %s1618_s10 = sld [smem:[#allocation22_spill]] }
 0x251   : > { %408 = vmatpush.msra.mxu0 %v390_v22  ;;  %v456_v33 = vld [vmem:[#allocation7 + $0xa0] sm:$0xff]  ;;  %v386_v34 = vld [vmem:[#allocation7 + $0x58] sm:$0xff]  ;;  %v374_v35 = vld [vmem:[#allocation7 + $0x10] sm:$0xff]  ;;  %vm509_vm10 = vcmp.ge.s32.totalorder %v507_v11, 0  ;;  %vm511_vm11 = vcmp.lt.s32.totalorder %v507_v11, 16  ;;  %s775_s18 = sadd.s32 %s1252_s24, %s914_s9  ;;  %s1620_s25 = sld [smem:[#allocation23_spill]] }
 0x252   : > { %479 = vmatpush.msra.mxu3 %v459_v24  ;;  %438 = vmatpush.msra.mxu1 %v377_v26  ;;  %v455_v36 = vld [vmem:[#allocation7 + $0x98] sm:$0xff]  ;;  %v385_v37 = vld [vmem:[#allocation7 + $0x50] sm:$0xff]  ;;  %v373_v38 = vld [vmem:[#allocation7 + $0x8] sm:$0xff]  ;;  %s915_s1 = sshll.u32 %s775_s18, 3  ;;  %s779_s24 = sshll.u32 %s291_s6, 4  ;;  %s780_s24 = int_to_ptr.vmem [resolvable:$true] %s779_s24 }
 0x253   : > { %409 = vmatpush.msra.mxu0 %v389_v25  ;;  %v454_v39 = vld [vmem:[#allocation7 + $0x90] sm:$0xff]  ;;  %v384_v40 = vld [vmem:[#allocation7 + $0x48] sm:$0xff]  ;;  %v372_v42 = vld [vmem:[#allocation7] sm:$0xff]  ;;  %v508_v25 = vadd.s32 %v506_v3, %v505_v17  ;;  %s765_s12 = scalar_lea.sflag [#allocation6], %s289_s4 }
 0x254   : > { %480 = vmatpush.msra.mxu3 %v458_v27  ;;  %439 = vmatpush.msra.mxu1 %v376_v29  ;;  %v451_v41 = vld [vmem:[#allocation2 + $0x2] sm:$0xff]  ;;  %v452_v45 = vld [vmem:[#allocation2 + $0xa] sm:$0x3]  ;;  %v555_v49 = vld [vmem:[#allocation9 + $0x70] sm:$0xff] }
 0x255   : > { %410 = vmatpush.msra.mxu0 %v388_v28  ;;  %v381_v43 = vld [vmem:[#allocation2 + $0x1] sm:$0xff]  ;;  %v382_v46 = vld [vmem:[#allocation2 + $0x9] sm:$0x3]  ;;  %v554_v50 = vld [vmem:[#allocation9 + $0x68] sm:$0xff]  ;;  %vm510_vm13 = vcmp.ge.s32.totalorder %v508_v25, 0  ;;  %vm512_vm14 = vcmp.lt.s32.totalorder %v508_v25, 16 }
 0x256   : > { %481 = vmatpush.msra.mxu3 %v457_v30  ;;  %440 = vmatpush.msra.mxu1 %v375_v32  ;;  %v370_v44 = vld [vmem:[#allocation2] sm:$0xff]  ;;  %v371_v47 = vld [vmem:[#allocation2 + $0x8] sm:$0x3]  ;;  %v579_v51 = vld [vmem:[#allocation9 + $0x108] sm:$0xff] }
 0x257   : > { %411 = vmatpush.msra.mxu0 %v387_v31  ;;  %v556_v48 = vld [vmem:[#allocation9 + $0x78] sm:$0xff]  ;;  %596 = vmatpush.msra.mxu2 %v579_v51  ;;  %v578_v53 = vld [vmem:[#allocation9 + $0x100] sm:$0xff]  ;;  %v698_v54 = vld [vmem:[#allocation9 + $0x190] sm:$0xff]  ;;  %s1621_s17 = smov %s1620_s25  ;;  %s777_s21 = scalar_lea.hbm %s1620_s25, %s915_s1 }
 0x258   : > { %482 = vmatpush.msra.mxu3 %v456_v33  ;;  %441 = vmatpush.msra.mxu1 %v374_v35  ;;  %v699_v52 = vld [vmem:[#allocation9 + $0x198] sm:$0xff]  ;;  %v553_v55 = vld [vmem:[#allocation9 + $0x60] sm:$0xff]  ;;  %v697_v58 = vld [vmem:[#allocation9 + $0x188] sm:$0xff]  ;;  %s781_s11 = sshll.u32 %s777_s21, 4  ;;  %s1162_s18 = scalar_lea.hbm %s1621_s17, 32  ;;  %s782_s11 = int_to_ptr.hbm [resolvable:$true] %s781_s11 }
 0x259   : > { %412 = vmatpush.msra.mxu0 %v386_v34  ;;  %v577_v56 = vld [vmem:[#allocation9 + $0xf8] sm:$0xff]  ;;  %597 = vmatpush.msra.mxu2 %v578_v53  ;;  %v576_v60 = vld [vmem:[#allocation9 + $0xf0] sm:$0xff]  ;;  %v696_v61 = vld [vmem:[#allocation9 + $0x180] sm:$0xff]  ;;  %s1156_s15 = sshra.s32 %s782_s11, 4  ;;  %s1157_s15 = int_to_ptr.hbm [resolvable:$true] %s1156_s15 }
 0x25a   : > { %483 = vmatpush.msra.mxu3 %v455_v36  ;;  %442 = vmatpush.msra.mxu1 %v373_v38  ;;  %v552_v59 = vld [vmem:[#allocation9 + $0x58] sm:$0xff]  ;;  %v551_v62 = vld [vmem:[#allocation9 + $0x50] sm:$0xff]  ;;  %v575_v63 = vld [vmem:[#allocation9 + $0xe8] sm:$0xff]  ;;  %s1158_s30 = scalar_lea.hbm %s1157_s15, 8  ;;  %p1163_p13 = scmp.lt.s32.totalorder %s1157_s15, %s1621_s17 }
 0x25b   : > { %413 = vmatpush.msra.mxu0 %v385_v37  ;;  %598 = vmatpush.msra.mxu2 %v577_v56  ;;  %v695_v2 = vld [vmem:[#allocation9 + $0x178] sm:$0xff]  ;;  %v550_v4 = vld [vmem:[#allocation9 + $0x48] sm:$0xff]  ;;  %v574_v5 = vld [vmem:[#allocation9 + $0xe0] sm:$0xff]  ;;  %p1159_p8 = scmp.ne.s32.totalorder %s1157_s15, %s1158_s30  ;;  %p1164_p1 = scmp.lt.s32.totalorder %s1162_s18, %s1158_s30 }
 0x25c   : > { %484 = vmatpush.msra.mxu3 %v454_v39  ;;  %443 = vmatpush.msra.mxu1 %v372_v42  ;;  %v694_v8 = vld [vmem:[#allocation9 + $0x170] sm:$0xff]  ;;  %v549_v9 = vld [vmem:[#allocation9 + $0x40] sm:$0xff]  ;;  %v548_v12 = vld [vmem:[#allocation9 + $0x38] sm:$0xff] }
 0x25d   : > { %414 = vmatpush.msra.mxu0 %v384_v40  ;;  %907 = vmatmul.msk.f32.vlgmr.msra.gmra.mxu3 %vm293_vm0, %v451_v41  ;;  %v1050_v13 = vld [vmem:[%s1584_s2] ss:$0 sm:$0xff]  ;;  %v547_v15 = vld [vmem:[#allocation9 + $0x30] sm:$0xff]  ;;  %v546_v18 = vld [vmem:[#allocation9 + $0x28] sm:$0xff]  ;;  %p1160_p9 = pnand %p1159_p8, %p1380_p6  ;;  %p1165_p4 = por %p1164_p1, %p1163_p13 }
 0x25e   : > { %903 = vmatmul.msk.f32.vlgmr.msra.gmra.mxu0 %vm293_vm0, %v381_v43  ;;  %905 = vmatmul.msk.f32.vlgmr.msra.gmra.mxu1 %vm293_vm0, %v370_v44  ;;  %vm513_vm12 = vmand %vm509_vm10, %vm511_vm11  ;;  %v545_v22 = vld [vmem:[#allocation9 + $0x20] sm:$0xff]  ;;  %v573_v32 = vld [vmem:[#allocation9 + $0xd8] sm:$0xff] }
 0x25f   : > { %639 = vmatpush.msrb.mxu1 %v556_v48  ;;  %716 = vmatpush.msrb.mxu3 %v699_v52  ;;  %vm514_vm15 = vmand %vm510_vm13, %vm512_vm14  ;;  %v693_v33 = vld [vmem:[#allocation9 + $0x168] sm:$0xff]  ;;  %v544_v34 = vld [vmem:[#allocation9 + $0x18] sm:$0xff]  ;;  %p1161_p12 = pneg %p1160_p9 }
 0x260   : > { %599 = vmatpush.msra.mxu2 %v576_v60  ;;  %v572_v35 = vld [vmem:[#allocation9 + $0xd0] sm:$0xff]  ;;  %v692_v36 = vld [vmem:[#allocation9 + $0x160] sm:$0xff]  ;;  %v571_v38 = vld [vmem:[#allocation9 + $0xc8] sm:$0xff] }
 0x261   : > { %640 = vmatpush.msrb.mxu1 %v555_v49  ;;  %717 = vmatpush.msrb.mxu3 %v698_v54  ;;  %v543_v37 = vld [vmem:[#allocation9 + $0x10] sm:$0xff]  ;;  %v691_v39 = vld [vmem:[#allocation9 + $0x158] sm:$0xff]  ;;  %v542_v40 = vld [vmem:[#allocation9 + $0x8] sm:$0xff]  ;;  %p1166_p11 = pnand %p1165_p4, %p1161_p12 }
 0x262   : > { %600 = vmatpush.msra.mxu2 %v575_v63  ;;  %v570_v41 = vld [vmem:[#allocation9 + $0xc0] sm:$0xff]  ;;  %v690_v42 = vld [vmem:[#allocation9 + $0x150] sm:$0xff]  ;;  %v569_v44 = vld [vmem:[#allocation9 + $0xb8] sm:$0xff] }
 0x263   : > { %641 = vmatpush.msrb.mxu1 %v554_v50  ;;  %718 = vmatpush.msrb.mxu3 %v697_v58  ;;  %v541_v43 = vld [vmem:[#allocation9] sm:$0xff]  ;;  %v567_v48 = vld [vmem:[#allocation9 + $0xa8] sm:$0xff]  ;;  %v687_v49 = vld [vmem:[#allocation9 + $0x138] sm:$0xff] }
 0x264   : > { %601 = vmatpush.msra.mxu2 %v574_v5  ;;  %v566_v50 = vld [vmem:[#allocation9 + $0xa0] sm:$0xff]  ;;  %v686_v51 = vld [vmem:[#allocation9 + $0x130] sm:$0xff]  ;;  %v565_v53 = vld [vmem:[#allocation9 + $0x98] sm:$0xff] }
 0x265   : > { %908 = vmatmul.msk.f32.gmra.mxu3 %vm293_vm0, %v452_v45  ;;  %642 = vmatpush.msrb.mxu1 %v553_v55  ;;  %v689_v45 = vld [vmem:[#allocation9 + $0x148] sm:$0xff]  ;;  %v580_v52 = vld [vmem:[#allocation9 + $0x110] sm:$0xff]  ;;  %v684_v56 = vld [vmem:[#allocation9 + $0x120] sm:$0xff] }
 0x266   : > { %904 = vmatmul.msk.f32.gmra.mxu0 %vm293_vm0, %v382_v46  ;;  %906 = vmatmul.msk.f32.gmra.mxu1 %vm293_vm0, %v371_v47  ;;  %vm521_vm0 = vcmask 123904   ;;  %v581_v46 = vld [vmem:[#allocation9 + $0x118] sm:$0xff]  ;;  %v568_v47 = vld [vmem:[#allocation9 + $0xb0] sm:$0xff]  ;;  %v685_v54 = vld [vmem:[#allocation9 + $0x128] sm:$0xff] }
 0x267   : > { %643 = vmatpush.msrb.mxu1 %v552_v59  ;;  %719 = vmatpush.msrb.mxu3 %v696_v61  ;;  %522 = vst.msk [vmem:[#allocation3 + $0x18] sm:$0x3] %vm521_vm0, %v1274_v0  ;;  %v688_v0 = vld [vmem:[#allocation9 + $0x140] sm:$0xff]  ;;  %v564_v55 = vld [vmem:[#allocation9 + $0x90] sm:$0xff]  ;;  %v558_v57 = vld [vmem:[#allocation9 + $0x88] sm:$0xff] }
 0x268   : > { %602 = vmatpush.msra.mxu2 %v573_v32  ;;  %630 = vmatpush.msrb.mxu0 %v581_v46  ;;  %v557_v58 = vld [vmem:[#allocation9 + $0x80] sm:$0xff]  ;;  %v701_v59 = vld [vmem:[#allocation9 + $0x1a8] sm:$0xff]  ;;  %v1051_v32 = vld [vmem:[%s1618_s10] ss:$0 sm:$0xff] }
 0x269   : > { %644 = vmatpush.msrb.mxu1 %v551_v62  ;;  %720 = vmatpush.msrb.mxu3 %v695_v2  ;;  %v700_v60 = vld [vmem:[#allocation9 + $0x1a0] sm:$0xff] }
 0x26a   : > { %603 = vmatpush.msra.mxu2 %v572_v35  ;;  %631 = vmatpush.msrb.mxu0 %v580_v52 }
 0x26b   : > { %645 = vmatpush.msrb.mxu1 %v550_v4  ;;  %721 = vmatpush.msrb.mxu3 %v694_v8 }
 0x26c   : > { %604 = vmatpush.msra.mxu2 %v571_v38  ;;  %750 = vmatpush.msra.mxu0 %v701_v59 }
 0x26d   : > { %646 = vmatpush.msrb.mxu1 %v549_v9  ;;  %722 = vmatpush.msrb.mxu3 %v693_v33 }
 0x26e   : > { %605 = vmatpush.msra.mxu2 %v570_v41  ;;  %751 = vmatpush.msra.mxu0 %v700_v60 }
 0x26f   : > { %647 = vmatpush.msrb.mxu1 %v548_v12  ;;  %723 = vmatpush.msrb.mxu3 %v692_v36 }
 0x270   : > { %606 = vmatpush.msra.mxu2 %v569_v44 }
 0x271   : > { %648 = vmatpush.msrb.mxu1 %v547_v15  ;;  %724 = vmatpush.msrb.mxu3 %v691_v39 }
 0x272   : > { %607 = vmatpush.msra.mxu2 %v568_v47 }
 0x273   : > { %649 = vmatpush.msrb.mxu1 %v546_v18  ;;  %725 = vmatpush.msrb.mxu3 %v690_v42 }
 0x274   : > { %608 = vmatpush.msra.mxu2 %v567_v48 }
 0x275   : > { %650 = vmatpush.msrb.mxu1 %v545_v22  ;;  %726 = vmatpush.msrb.mxu3 %v689_v45 }
 0x276   : > { %609 = vmatpush.msra.mxu2 %v566_v50 }
 0x277   : > { %651 = vmatpush.msrb.mxu1 %v544_v34  ;;  %727 = vmatpush.msrb.mxu3 %v688_v0 }
 0x278   : > { %610 = vmatpush.msra.mxu2 %v565_v53 }
 0x279   : > { %652 = vmatpush.msrb.mxu1 %v543_v37  ;;  %728 = vmatpush.msrb.mxu3 %v687_v49 }
 0x27a   : > { %611 = vmatpush.msra.mxu2 %v564_v55 }
 0x27b   : > { %653 = vmatpush.msrb.mxu1 %v542_v40  ;;  %729 = vmatpush.msrb.mxu3 %v686_v51 }
 0x27c   : > { %673 = vmatpush.msrb.mxu2 %v558_v57 }
 0x27d   : > { %654 = vmatpush.msrb.mxu1 %v541_v43  ;;  %730 = vmatpush.msrb.mxu3 %v685_v54 }
 0x27e   : > { %674 = vmatpush.msrb.mxu2 %v557_v58 }
 0x27f   : > { %731 = vmatpush.msrb.mxu3 %v684_v56 }
 0x2db   : > { %v416_v6 = vpop.f32.mrf.mxu0  ;;  %v445_v7 = vpop.f32.mrf.mxu1 }
 0x2dc   : > { %v446_v10 = vadd.f32 %v445_v7, %v416_v6 }
 0x2e0   : > { %v486_v14 = vpop.f32.mrf.mxu3 }
 0x2e1   : > { %v492_v16 = vadd.f32 %v486_v14, %v446_v10 }
 0x2e3   : > { %v498_v19 = vadd.f32 %v1050_v13, %v492_v16  ;;  %v419_v20 = vpop.f32.mrf.mxu0  ;;  %v448_v21 = vpop.f32.mrf.mxu1 }
 0x2e4   : > { %v449_v23 = vadd.f32 %v448_v21, %v419_v20 }
 0x2e5   : > { %v500_v24 = vmax.f32 %v498_v19, 0.0 }
 0x2e7   : > { %v515_v26 = vsel %vm513_vm12, %v500_v24, 0.0 }
 0x2e8   : > { %v489_v27 = vpop.f32.mrf.mxu3  ;;  %525 = vrot.lane.b32.xlu0 %v515_v26, %s1279_s26 }
 0x2e9   : > { %v493_v28 = vadd.f32 %v489_v27, %v449_v23 }
 0x2eb   : > { %v499_v29 = vadd.f32 %v1050_v13, %v493_v28 }
 0x2ed   : > { %v501_v30 = vmax.f32 %v499_v29, 0.0 }
 0x2ef   : > { %v516_v31 = vsel %vm514_vm15, %v501_v30, 0.0 }
 0x2f0   : > { %527 = vrot.lane.b32.xlu0 %v516_v31, %s1279_s26 }
 0x35a   : > { %v526_v61 = vpop.permute.xlu0 %525 }
 0x35b   : > { %532 = vst.msk [vmem:[#allocation3] sm:$0xff] %vm531_vm1, %v526_v61 }
 0x35c   : > { %534 = vst.msk [vmem:[#allocation3 + $0x8] sm:$0xff] %vm533_vm2, %v526_v61 }
 0x362   : > { %v528_v62 = vpop.permute.xlu0 %527  ;;  %v539_v63 = vld [vmem:[#allocation3] sm:$0xff] }
 0x363   : > { %536 = vst.msk [vmem:[#allocation3 + $0x10] sm:$0x3] %vm535_vm3, %v528_v62  ;;  %655 = vmatmul.f32.vlgmr.msrb.gmra.mxu1 %v539_v63  ;;  %v559_v1 = vld [vmem:[#allocation3] sm:$0xfe]  ;;  %v560_v3 = vld [vmem:[#allocation3 + $0x8] sm:$0xfe] }
 0x364   : > { %538 = vst.msk [vmem:[#allocation3 + $0x18] sm:$0x3] %vm537_vm4, %v528_v62  ;;  %v679_v2 = vld [vmem:[#allocation3] sm:$0xfc]  ;;  %v587_v6 = vrot.slane %v559_v1, 1  ;;  %v590_v11 = vrot.slane %v560_v3, 1 }
 0x365   : > { %v707_v9 = vrot.slane %v679_v2, 2  ;;  %v680_v17 = vld [vmem:[#allocation3 + $0x8] sm:$0xfc] }
 0x366   : > { %v710_v19 = vrot.slane %v680_v17, 2  ;;  %v540_v20 = vld [vmem:[#allocation3 + $0x8] sm:$0xff] }
 0x36a   : > { %v561_v4 = vld [vmem:[#allocation3 + $0x10] sm:$0x1] }
 0x36b   : > { %v681_v5 = vld [vmem:[#allocation3 + $0x10] sm:$0x3]  ;;  %v588_v7 = vrot.slane %v561_v4, 1  ;;  %v562_v8 = vld [vmem:[#allocation3 + $0x18] sm:$0x1] }
 0x36c   : > { %v708_v10 = vrot.slane %v681_v5, 2  ;;  %v591_v12 = vrot.slane %v562_v8, 1  ;;  %v682_v16 = vld [vmem:[#allocation3 + $0x18] sm:$0x3] }
 0x36d   : > { %v589_v13 = vsel %vm586_vm5, %v587_v6, %v588_v7  ;;  %v711_v18 = vrot.slane %v682_v16, 2 }
 0x36e   : > { %v709_v14 = vsel %vm706_vm6, %v707_v9, %v708_v10  ;;  %612 = vmatmul.f32.vlgmr.msra.gmra.mxu2 %v589_v13  ;;  %v592_v15 = vsel %vm586_vm5, %v590_v11, %v591_v12 }
 0x36f   : > { %732 = vmatmul.f32.vlgmr.msrb.gmra.mxu3 %v709_v14  ;;  %910 = vmatmul.msk.f32.vlgmr.msrb.gmra.mxu0 %vm518_vm9, %v592_v15  ;;  %v712_v21 = vsel %vm706_vm6, %v710_v19, %v711_v18 }
 0x376   : > { %911 = vmatmul.msk.f32.vlgmr.msrb.gmra.mxu2 %vm518_vm9, %v540_v20 }
 0x377   : > { %912 = vmatmul.msk.f32.vlgmr.msra.gmra.mxu0 %vm518_vm9, %v712_v21 }
 0x3e0   : > { %v656_v25 = vpop.f32.mrf.mxu1 }
 0x3ec   : > { %v633_v22 = vpop.f32.mrf.mxu0 }
 0x3f1   : > { %v613_v23 = vpop.f32.mrf.mxu2 }
 0x3f2   : > { %v634_v24 = vadd.f32 %v633_v22, %v613_v23  ;;  %v733_v28 = vpop.f32.mrf.mxu3 }
 0x3f4   : > { %v753_v26 = vpop.f32.mrf.mxu0  ;;  %v657_v27 = vadd.f32 %v656_v25, %v634_v24 }
 0x3f5   : > { %v754_v30 = vadd.f32 %v753_v26, %v733_v28 }
 0x3f9   : > { %v676_v29 = vpop.f32.mrf.mxu2 }
 0x3fa   : > { %v677_v31 = vadd.f32 %v676_v29, %v657_v27 }
 0x3fc   : > { %v756_v33 = vadd.f32 %v754_v30, %v677_v31 }
 0x3fe   : > { %v761_v34 = vadd.f32 %v1051_v32, %v756_v33 }
 0x400   : > { %v762_v35 = vmax.f32 %v761_v34, 0.0 }
 0x402   : > { %763 = vst [vmem:[%s291_s6] sm:$0xff] %v762_v35 }
 0x403   : > { %1169 = shalt.err (!%p1166_p11)
}
 0x404   : > { %929 = dma.vmem_to_hbm [thread:$0]  (%p1380_p6), %s780_s24, 128, %s782_s11, %s765_s12  }
 0x405 PF: > { %s1622_s4 = sld [smem:[#allocation14_spill]]  ;;  %p951_p0 = scmp.ge.s32.totalorder %s1268_s28, 2 }
 0x407   : > { %p943_p2 = pnand %p951_p0, %p1386_p10 }
 0x409   : > { %p944_p3 = pneg %p943_p2 }
 0x40b   : > { %s793_s6 = sand.u32 1, %s1622_s4  }
 0x40c   : > { %s794_s8 = scalar_lea.sflag [#allocation6], %s793_s6 }
 0x40d   : > { %1223 = dma.done.wait (%p944_p3), %s794_s8, 128  }
 0x40e   : > { %1225 = vsyncadd (%p944_p3), %s794_s8, 4294967168  ;;  %s22_s28 = sadd.s32 1, %s1268_s28   ;;  %s1624_s24 = sld [smem:[#allocation15_spill]] }
 0x40f   : > { %p19_p5 = scmp.ge.s32.totalorder %s22_s28, 6   ;;  %s1625_s26 = sld [smem:[#allocation18_spill]] }
 0x410   : > { %s1626_s10 = sld [smem:[#allocation19_spill]]  ;;  %s1627_s18 = smov %s1232_s19 }
 0x411   : > { %s1628_s19 = smov %s1236_s20  ;;  %s1629_s20 = smov %s1437_s14 }
 0x412   : > { %s1630_s21 = smov %s1244_s22  ;;  %s1631_s22 = smov %s1248_s23 }
 0x413   : > { %s1632_s23 = smov %s1434_s3  ;;  %s1633_s25 = smov %s1264_s27 }
 0x414   :  { %21 = sbr.rel (!%p19_p5) target bundleno = 15 (0xf), region = 115 }
 0x416   : > { %s1634_s27 = smov %s1626_s10 }
 0x419   :  { %800 = vsyncpa [#allocation5], 1 }
 0x41a   :  { %802 = vsyncpa [#allocation5 + $0x1], 1 }
 0x41b   :  { %803 = vsyncpa [#allocation8], 1 }
 0x41c   :  { %804 = vsyncpa [#allocation6], 1 }
 0x41d   :  { %806 = vsyncpa [#allocation6 + $0x1], 1 }

</bundles_post_ra>
